<compile_context>
chip_gen: v7x
topology: tpu7x:2x2x1
jax: 0.10.0
libtpu: 0.0.40
codegen_flags: <defaults>
</compile_context>

<pallas_src>
import jax
import jax.numpy as jnp
from jax.experimental import pallas as pl
from jax.experimental.pallas import tpu as pltpu


def _self_attention_kernel(q_ref, val_ref, w1_ref, b1_ref, vw_ref, vb_ref,
                           ctx_ref, score_ref):
    # q_ref:   (TB*S, IN)   (pre-flattened in the wrapper)
    # val_ref: (TB, S, DV)
    # w1_ref:  (IN, OUT)    b1_ref:  (1, OUT)
    # vw_ref:  (1, OUT)     vb_ref:  (1, 1)
    # ctx_ref: (TB, DV)     score_ref: (TB, S, 1)
    TB, S, DV = val_ref.shape

    # ---- h = tanh(W1(query)): one fused 2-D MXU matmul, f32 accumulation ----
    h = jnp.tanh(
        jnp.dot(q_ref[...], w1_ref[...], preferred_element_type=jnp.float32)
        + b1_ref[...]
    )                                                        # (TB*S, OUT) f32

    # ---- logits = V(h): (OUT -> 1) projection as VPU mul + lane reduce ------
    logits = jnp.sum(h * vw_ref[...], axis=-1, keepdims=True) + vb_ref[...]

    # sigmoid via exp (EUP) + exact reciprocal; only the small score vector is
    # reshaped (sublane split only: (TB*S, 1) -> (TB, S, 1), lane dim stays 1).
    score_flat = pl.reciprocal(1.0 + jnp.exp(-logits), approx=False)  # (TB*S, 1)
    score3 = score_flat.reshape(TB, S, 1)                             # (TB, S, 1)

    # ---- context = (sum_s score*values) / (sum_s score) ----------------------
    denom = jnp.sum(score3, axis=1)                          # (TB, 1)
    ctx_un = jnp.sum(score3 * val_ref[...].astype(jnp.float32), axis=1)  # (TB, DV)
    ctx = ctx_un * pl.reciprocal(denom, approx=False)        # normalize once

    ctx_ref[...] = ctx.astype(ctx_ref.dtype)
    score_ref[...] = score3.astype(score_ref.dtype)


def _divisors(n):
    out = set()
    d = 1
    while d * d <= n:
        if n % d == 0:
            out.add(d)
            out.add(n // d)
        d += 1
    return sorted(out)


def _pick_block_b(B, S, in_units, dv, in_itemsize, out_itemsize, tile_budget,
                  min_steps=2):
    """Largest batch-rows-per-step that (a) divides B, (b) keeps every block
    (8,128)-safe (block_b a multiple of 8, or the full batch), (c) fits the
    double-buffered VMEM tile budget, preferring grids with >= min_steps steps
    so both v7x TensorCores get work and DMA/compute pipelining is active."""
    per_row = 2 * ((S * in_units + S * dv) * in_itemsize
                   + (dv + S) * out_itemsize)          # x2: double-buffered IO
    max_rows = max(1, tile_budget // max(per_row, 1))

    cands = [d for d in _divisors(B) if (d % 8 == 0) or (d == B)]
    fitting = [d for d in cands if d <= max_rows]
    if not fitting:
        fitting = [min(cands)]                         # smallest aligned block
    multi = [d for d in fitting if B // d >= min_steps]
    return max(multi) if multi else max(fitting)


def self_attention(query, values, w1_w, w1_b, v_w, v_b, *,
                   block_b=None, compute_dtype=None, min_steps=2):
    """query: (B, S, IN), values: (B, S, DV).
    w1_w: (IN, OUT), w1_b: (OUT,)  -- W1 as x @ w1_w + w1_b (nn.Linear weight^T)
    v_w:  (OUT, 1),  v_b:  (1,)    -- V  as h @ v_w  + v_b
    compute_dtype: optional streaming dtype for query/values/w1_w (e.g.
    jnp.bfloat16); accumulation and all score math stay in f32.
    Returns (context (B, DV), score (B, S, 1)) in the original input dtype."""
    B, S, IN = query.shape
    DV = values.shape[2]
    OUT = w1_w.shape[1]
    out_dtype = query.dtype

    if compute_dtype is not None:
        query = query.astype(compute_dtype)
        values = values.astype(compute_dtype)
        w1_w = w1_w.astype(compute_dtype)

    # Generation-aware VMEM budgets (v7x: 64 MiB/TC, v5e/v6e: 128 MiB).
    try:
        vmem_cap = int(pltpu.get_tpu_info().vmem_capacity_bytes)
    except Exception:
        vmem_cap = 64 * 1024 * 1024
    vmem_limit = int(min(vmem_cap * 3 // 4, 96 * 1024 * 1024))
    tile_budget = vmem_cap // 4

    in_itemsize = jnp.dtype(query.dtype).itemsize
    out_itemsize = jnp.dtype(out_dtype).itemsize
    if block_b is None:
        block_b = _pick_block_b(B, S, IN, DV, in_itemsize, out_itemsize,
                                tile_budget, min_steps)
    assert B % block_b == 0, (B, block_b)
    grid = (B // block_b,)

    # Flatten batch/seq OUTSIDE the kernel (metadata-only in XLA) so the W1
    # projection streams one contiguous 2-D tile per step.
    q2 = query.reshape(B * S, IN)

    # Tiny params as >=2-D, lane-major, f32 blocks (resident every step).
    b1 = w1_b.reshape(1, OUT).astype(jnp.float32)
    vw = v_w.reshape(1, OUT).astype(jnp.float32)
    vb = v_b.reshape(1, 1).astype(jnp.float32)

    ctx, score = pl.pallas_call(
        _self_attention_kernel,
        out_shape=(
            jax.ShapeDtypeStruct((B, DV), out_dtype),
            jax.ShapeDtypeStruct((B, S, 1), out_dtype),
        ),
        grid=grid,
        in_specs=[
            pl.BlockSpec((block_b * S, IN), lambda b: (b, 0)),
            pl.BlockSpec((block_b, S, DV), lambda b: (b, 0, 0)),
            pl.BlockSpec((IN, OUT), lambda b: (0, 0)),
            pl.BlockSpec((1, OUT), lambda b: (0, 0)),
            pl.BlockSpec((1, OUT), lambda b: (0, 0)),
            pl.BlockSpec((1, 1), lambda b: (0, 0)),
        ],
        out_specs=(
            pl.BlockSpec((block_b, DV), lambda b: (b, 0)),
            pl.BlockSpec((block_b, S, 1), lambda b: (b, 0, 0)),
        ),
        compiler_params=pltpu.CompilerParams(
            dimension_semantics=("parallel",),
            vmem_limit_bytes=vmem_limit,
        ),
    )(q2, values, w1_w, b1, vw, vb)

    # score already carries PyTorch's trailing singleton: (B, S, 1).
    return ctx, score


if __name__ == "__main__":
    # Small shapes consistent with the module: batch=2, seq=8, in_units=32,
    # out_units=16, values feature dim=32.
    B, S, IN, OUT, DV = 2, 8, 32, 16, 32
    key = jax.random.PRNGKey(0)
    kq, kv, kw1, kb1, kvw, kvb = jax.random.split(key, 6)

    query = jax.random.normal(kq, (B, S, IN), dtype=jnp.float32)
    values = jax.random.normal(kv, (B, S, DV), dtype=jnp.float32)
    w1_w = 0.1 * jax.random.normal(kw1, (IN, OUT), dtype=jnp.float32)
    w1_b = 0.1 * jax.random.normal(kb1, (OUT,), dtype=jnp.float32)
    v_w = 0.1 * jax.random.normal(kvw, (OUT, 1), dtype=jnp.float32)
    v_b = 0.1 * jax.random.normal(kvb, (1,), dtype=jnp.float32)

    # Pure-JAX reference mirroring the PyTorch forward.
    def reference(q, v):
        h_ref = jnp.tanh(q @ w1_w + w1_b)
        score_ref = jax.nn.sigmoid(h_ref @ v_w + v_b)                # (B, S, 1)
        attn_ref = score_ref / jnp.sum(score_ref, axis=1, keepdims=True)
        ctx_ref = jnp.sum(attn_ref * v, axis=1)                      # (B, DV)
        return ctx_ref, score_ref

    ctx_ref, score_ref = reference(query, values)

    # --- f32 path: exact parity with the PyTorch module ----------------------
    ctx, score = self_attention(query, values, w1_w, w1_b, v_w, v_b)
    ctx, score = jax.block_until_ready((ctx, score))
    assert ctx.shape == (B, DV), ctx.shape
    assert score.shape == (B, S, 1), score.shape
    assert jnp.allclose(ctx, ctx_ref, atol=1e-5, rtol=1e-5), "context mismatch (f32)"
    assert jnp.allclose(score, score_ref, atol=1e-5, rtol=1e-5), "score mismatch (f32)"

    # --- bf16 streaming path: the bandwidth-optimized configuration ----------
    ctx16, score16 = self_attention(query, values, w1_w, w1_b, v_w, v_b,
                                    compute_dtype=jnp.bfloat16)
    ctx16, score16 = jax.block_until_ready((ctx16, score16))
    assert ctx16.shape == (B, DV) and score16.shape == (B, S, 1)
    assert jnp.allclose(ctx16, ctx_ref, atol=5e-2, rtol=5e-2), "context mismatch (bf16)"
    assert jnp.allclose(score16, score_ref, atol=5e-2, rtol=5e-2), "score mismatch (bf16)"

    # --- multi-step grid path (block_b=8, grid=2): exercises index maps -------
    B2 = 16
    kq2, kv2 = jax.random.split(jax.random.PRNGKey(1), 2)
    query2 = jax.random.normal(kq2, (B2, S, IN), dtype=jnp.float32)
    values2 = jax.random.normal(kv2, (B2, S, DV), dtype=jnp.float32)
    ctx2_ref, score2_ref = reference(query2, values2)
    ctx2, score2 = self_attention(query2, values2, w1_w, w1_b, v_w, v_b)
    ctx2, score2 = jax.block_until_ready((ctx2, score2))
    assert jnp.allclose(ctx2, ctx2_ref, atol=1e-5, rtol=1e-5), "context mismatch (grid=2)"
    assert jnp.allclose(score2, score2_ref, atol=1e-5, rtol=1e-5), "score mismatch (grid=2)"

    print("KERNEL_OK")
</pallas_src>

<mosaic_0001>
module attributes {stable_mosaic.version = 11 : i64} {
  func.func @_self_attention_kernel(%arg0: i32, %arg1: memref<16x32xf32, #tpu.memory_space<vmem>>, %arg2: memref<2x8x32xf32, #tpu.memory_space<vmem>>, %arg3: memref<32x16xf32, #tpu.memory_space<vmem>>, %arg4: memref<1x16xf32, #tpu.memory_space<vmem>>, %arg5: memref<1x16xf32, #tpu.memory_space<vmem>>, %arg6: memref<1x1xf32, #tpu.memory_space<vmem>>, %arg7: memref<2x32xf32, #tpu.memory_space<vmem>>, %arg8: memref<2x8x1xf32, #tpu.memory_space<vmem>>) attributes {dimension_semantics = [#tpu.dimension_semantics<parallel>], iteration_bounds = array<i64: 1>, scalar_prefetch = 0 : i64, scratch_operands = 0 : i64, tpu.core_type = #tpu.core_type<tc>, window_params = [{transform_indices = @transform_0, window_bounds = array<i64: 16, 32>}, {transform_indices = @transform_1, window_bounds = array<i64: 2, 8, 32>}, {pipeline_mode = #tpu.pipeline_mode<synchronous>, transform_indices = @transform_2, window_bounds = array<i64: 32, 16>}, {pipeline_mode = #tpu.pipeline_mode<synchronous>, transform_indices = @transform_3, window_bounds = array<i64: 1, 16>}, {pipeline_mode = #tpu.pipeline_mode<synchronous>, transform_indices = @transform_4, window_bounds = array<i64: 1, 16>}, {pipeline_mode = #tpu.pipeline_mode<synchronous>, transform_indices = @transform_5, window_bounds = array<i64: 1, 1>}, {transform_indices = @transform_6, window_bounds = array<i64: 2, 32>}, {transform_indices = @transform_7, window_bounds = array<i64: 2, 8, 1>}]} {
    %c0 = arith.constant 0 : index
    %c0_0 = arith.constant 0 : index
    %0 = vector.load %arg1[%c0, %c0_0] : memref<16x32xf32, #tpu.memory_space<vmem>>, vector<16x32xf32>
    %c0_1 = arith.constant 0 : index
    %c0_2 = arith.constant 0 : index
    %1 = vector.load %arg3[%c0_1, %c0_2] : memref<32x16xf32, #tpu.memory_space<vmem>>, vector<32x16xf32>
    %cst = arith.constant dense<0.000000e+00> : vector<16x16xf32>
    %2 = tpu.matmul %0, %1, %cst {dimension_numbers = #tpu.dot_dimension_numbers<[1], [0], [0], [1], [0, 0, 1, 1], [], []>} : vector<16x32xf32>, vector<32x16xf32>, vector<16x16xf32> -> vector<16x16xf32>
    %c0_3 = arith.constant 0 : index
    %c0_4 = arith.constant 0 : index
    %3 = vector.load %arg4[%c0_3, %c0_4] : memref<1x16xf32, #tpu.memory_space<vmem>>, vector<1x16xf32>
    %4 = vector.broadcast %3 : vector<1x16xf32> to vector<16x16xf32>
    %5 = arith.addf %2, %4 : vector<16x16xf32>
    %6 = math.tanh %5 : vector<16x16xf32>
    %c0_5 = arith.constant 0 : index
    %c0_6 = arith.constant 0 : index
    %7 = vector.load %arg5[%c0_5, %c0_6] : memref<1x16xf32, #tpu.memory_space<vmem>>, vector<1x16xf32>
    %8 = vector.broadcast %7 : vector<1x16xf32> to vector<16x16xf32>
    %9 = arith.mulf %6, %8 : vector<16x16xf32>
    %cst_7 = arith.constant dense<0.000000e+00> : vector<16xf32>
    %10 = vector.multi_reduction <add>, %9, %cst_7 [1] : vector<16x16xf32> to vector<16xf32>
    %11 = vector.shape_cast %10 : vector<16xf32> to vector<16x1xf32>
    %c0_8 = arith.constant 0 : index
    %c0_9 = arith.constant 0 : index
    %12 = vector.load %arg6[%c0_8, %c0_9] : memref<1x1xf32, #tpu.memory_space<vmem>>, vector<1x1xf32>
    %13 = vector.broadcast %12 : vector<1x1xf32> to vector<16x1xf32>
    %14 = arith.addf %11, %13 : vector<16x1xf32>
    %cst_10 = arith.constant 0.000000e+00 : f32
    %15 = vector.broadcast %cst_10 : f32 to vector<16x1xf32>
    %16 = arith.subf %15, %14 : vector<16x1xf32>
    %17 = math.exp %16 : vector<16x1xf32>
    %cst_11 = arith.constant 1.000000e+00 : f32
    %18 = vector.broadcast %cst_11 : f32 to vector<16x1xf32>
    %19 = arith.addf %18, %17 : vector<16x1xf32>
    %20 = tpu.reciprocal %19 : vector<16x1xf32> -> vector<16x1xf32>
    %21 = vector.shape_cast %20 : vector<16x1xf32> to vector<2x8x1xf32>
    %cst_12 = arith.constant dense<0.000000e+00> : vector<2x1xf32>
    %22 = vector.multi_reduction <add>, %21, %cst_12 [1] : vector<2x8x1xf32> to vector<2x1xf32>
    %c0_13 = arith.constant 0 : index
    %c0_14 = arith.constant 0 : index
    %c0_15 = arith.constant 0 : index
    %23 = vector.load %arg2[%c0_13, %c0_14, %c0_15] : memref<2x8x32xf32, #tpu.memory_space<vmem>>, vector<2x8x32xf32>
    %24 = vector.broadcast %21 : vector<2x8x1xf32> to vector<2x8x32xf32>
    %25 = arith.mulf %24, %23 : vector<2x8x32xf32>
    %cst_16 = arith.constant dense<0.000000e+00> : vector<2x32xf32>
    %26 = vector.multi_reduction <add>, %25, %cst_16 [1] : vector<2x8x32xf32> to vector<2x32xf32>
    %27 = tpu.reciprocal %22 : vector<2x1xf32> -> vector<2x1xf32>
    %28 = vector.broadcast %27 : vector<2x1xf32> to vector<2x32xf32>
    %29 = arith.mulf %26, %28 : vector<2x32xf32>
    %c0_17 = arith.constant 0 : index
    %c0_18 = arith.constant 0 : index
    %30 = vector.load %arg7[%c0_17, %c0_18] : memref<2x32xf32, #tpu.memory_space<vmem>>, vector<2x32xf32>
    tpu.vector_store %arg7[%c0_17, %c0_18], %29 {strides = array<i32>} : memref<2x32xf32, #tpu.memory_space<vmem>>, vector<2x32xf32>,
    %c0_19 = arith.constant 0 : index
    %c0_20 = arith.constant 0 : index
    %c0_21 = arith.constant 0 : index
    %31 = vector.load %arg8[%c0_19, %c0_20, %c0_21] : memref<2x8x1xf32, #tpu.memory_space<vmem>>, vector<2x8x1xf32>
    tpu.vector_store %arg8[%c0_19, %c0_20, %c0_21], %21 {strides = array<i32>} : memref<2x8x1xf32, #tpu.memory_space<vmem>>, vector<2x8x1xf32>,
    return
  }
  func.func @transform_0(%arg0: i32) -> (i32, i32) {
    %c0_i32 = arith.constant 0 : i32
    %c0_i32_0 = arith.constant 0 : i32
    return %arg0, %c0_i32 : i32, i32
  }
  func.func @transform_1(%arg0: i32) -> (i32, i32, i32) {
    %c0_i32 = arith.constant 0 : i32
    %c0_i32_0 = arith.constant 0 : i32
    %c0_i32_1 = arith.constant 0 : i32
    return %arg0, %c0_i32, %c0_i32_0 : i32, i32, i32
  }
  func.func @transform_2(%arg0: i32) -> (i32, i32) {
    %c0_i32 = arith.constant 0 : i32
    %c0_i32_0 = arith.constant 0 : i32
    %c0_i32_1 = arith.constant 0 : i32
    return %c0_i32, %c0_i32_0 : i32, i32
  }
  func.func @transform_3(%arg0: i32) -> (i32, i32) {
    %c0_i32 = arith.constant 0 : i32
    %c0_i32_0 = arith.constant 0 : i32
    %c0_i32_1 = arith.constant 0 : i32
    return %c0_i32, %c0_i32_0 : i32, i32
  }
  func.func @transform_4(%arg0: i32) -> (i32, i32) {
    %c0_i32 = arith.constant 0 : i32
    %c0_i32_0 = arith.constant 0 : i32
    %c0_i32_1 = arith.constant 0 : i32
    return %c0_i32, %c0_i32_0 : i32, i32
  }
  func.func @transform_5(%arg0: i32) -> (i32, i32) {
    %c0_i32 = arith.constant 0 : i32
    %c0_i32_0 = arith.constant 0 : i32
    %c0_i32_1 = arith.constant 0 : i32
    return %c0_i32, %c0_i32_0 : i32, i32
  }
  func.func @transform_6(%arg0: i32) -> (i32, i32) {
    %c0_i32 = arith.constant 0 : i32
    %c0_i32_0 = arith.constant 0 : i32
    return %arg0, %c0_i32 : i32, i32
  }
  func.func @transform_7(%arg0: i32) -> (i32, i32, i32) {
    %c0_i32 = arith.constant 0 : i32
    %c0_i32_0 = arith.constant 0 : i32
    %c0_i32_1 = arith.constant 0 : i32
    return %arg0, %c0_i32, %c0_i32_0 : i32, i32, i32
  }
}

</mosaic_0001>

<bundles_post_ra>
// kernel: tpu_custom_call.1
= control target key start
LH: loop header
LB: loop body
LE: loop exit
PB: predicated region body
PF: predicated region fallthrough
CT: control target
= control target key end

     0   :  { %s415_s0 = inlined_call_operand.vmem [shape: f32[16,32], index: 0, kind: input, shape index: {}]   ;;  %s416_s1 = inlined_call_operand.vmem [shape: f32[2,8,32], index: 1, kind: input, shape index: {}]   ;;  %s417_s2 = inlined_call_operand.vmem [shape: f32[32,16], index: 2, kind: input, shape index: {}]   ;;  %s418_s3 = inlined_call_operand.vmem [shape: f32[1,16], index: 3, kind: input, shape index: {}]   ;;  %s419_s4 = inlined_call_operand.vmem [shape: f32[1,16], index: 4, kind: input, shape index: {}]   ;;  %s420_s5 = inlined_call_operand.<no memory space> [shape: f32[1,1], index: 5, kind: input, shape index: {}]   ;;  %s421_s6 = inlined_call_operand.hbm [shape: f32[2,32], index: 6, kind: output, shape index: {0}]   ;;  %s422_s7 = inlined_call_operand.vmem [shape: f32[2,8,1], index: 7, kind: output, shape index: {1}]  }
   0x1   :  { %v13_v0 = vstv %s420_s5 }
   0x2   :  { %14 = vst [vmem:[#allocation2] sm:$0x1] %v13_v0 }
   0x3   :  { %v30_v1 = vld [vmem:[%s417_s2] sm:$0xff]  ;;  %v31_v2 = vld [vmem:[%s417_s2 + $0x8] sm:$0xff]  ;;  %v32_v3 = vld [vmem:[%s417_s2 + $0x10] sm:$0xff]  ;;  %vm41_vm0 = vcmask 261120  }
   0x4   :  { %v266_v4 = vpack.c.bf16 %v31_v2, %v30_v1  ;;  %v33_v5 = vld [vmem:[%s417_s2 + $0x18] sm:$0xff]  ;;  %v28_v6 = vld [vmem:[%s415_s0] sm:$0xff] }
   0x5   :  { %v270_v7 = vpack.c.bf16 %v33_v5, %v32_v3  ;;  %263 = vmatprep.mubr.msk.f32.mxu0 %vm41_vm0, %v28_v6 }
   0x6   :  { %15 = vsyncpa [#allocation4], 0  ;;  %267 = vmatprep.subr.bf16.mxu0 %v266_v4  ;;  %v29_v8 = vld [vmem:[%s415_s0 + $0x8] sm:$0xff]  ;;  %v244_v9 = vld [vmem:[%s418_s3] ss:$0 sm:$0xff]  ;;  %vm134_vm1 = vcmask 130048  }
   0x7   :  { %269 = vmatpush3.bf16.msra.mxu0 %v266_v4  ;;  %v247_v14 = vld [vmem:[%s419_s4] ss:$0 sm:$0xff]  ;;  %v318_v21 = vmov 0   ;;  %vm160_vm2 = vcmask 7168   ;;  %v176_v56 = vld [vmem:[%s416_s1 + $0x8] sm:$0xff]  ;;  %vm219_vm3 = vcmask 1041409  }
   0x8   :  { %271 = vmatprep.subr.bf16.mxu0 %v270_v7  ;;  %276 = vset.pattern.permute.xlu1 %v318_v21  ;;  %v175_v53 = vld [vmem:[%s416_s1] sm:$0xff]  ;;  %s319_s1 = smov [#allocation3]   ;;  %vm222_vm4 = vcmask 254976  }
   0x9   :  { %277 = vset.pattern.permute.xlu0 %v318_v21  ;;  %v248_v22 = vld [vmem:[#allocation2] ss:$0 sm:$0xff]  ;;  %s232_s21 = sshll.u32 %s319_s1, 4  ;;  %s233_s21 = int_to_ptr.vmem [resolvable:$true] %s232_s21 }
   0xa   :  { %s294_s22 = scalar_lea.vmem %s233_s21, 32  ;;  %p299_p1 = scmp.lt.s32.totalorder %s233_s21, %s233_s21 }
   0xb   :  { %273 = vmatpush3.bf16.msra.mxu0 %v270_v7  ;;  %p295_p0 = scmp.ne.s32.totalorder %s233_s21, %s294_s22  ;;  %p300_p2 = scmp.lt.s32.totalorder %s294_s22, %s294_s22 }
   0xd   :  { %p301_p3 = por %p300_p2, %p299_p1 }
   0xe   :  { %264 = vmatmul.mubr.msk.f32.vlgmr.msra.gmra.mrb[0].mxu0 %vm41_vm0, %v29_v8 }
   0xf   :  { %p302_p4 = pnand %p301_p3, %p295_p0 }
  0xe1   :  { %v265_v10 = vpop.f32.mrb[0].mxu0 }
  0xe2   :  { %v120_v11 = vadd.f32 %v265_v10, %v244_v9  ;;  %v114_v12 = vpop.f32.mrb[1].mxu0 }
  0xe3   :  { %v115_v13 = vadd.f32 %v244_v9, %v114_v12 }
  0xe4   :  { %278 = vtanh.f32 %v120_v11 }
  0xe5   :  { %280 = vtanh.f32 %v115_v13 }
  0xee   :  { %v279_v15 = vpop.eup %278 }
  0xef   :  { %v281_v16 = vpop.eup %280  ;;  %v133_v19 = vmul.f32 %v279_v15, %v247_v14 }
  0xf0   :  { %v132_v17 = vmul.f32 %v281_v16, %v247_v14 }
  0xf1   :  { %v138_v20 = vsel %vm134_vm1, %v133_v19, 0.0 }
  0xf2   :  { %v135_v18 = vsel %vm134_vm1, %v132_v17, 0.0 }
  0xf3   :  { %136 = vadd.xlane.f32.xlu0 %v135_v18 }
  0xf7   :  { %139 = vadd.xlane.f32.xlu0 %v138_v20 }
 0x180   :  { %v137_v23 = vpop.xlane.xlu0 %136 }
 0x181   :  { %v148_v24 = vadd.f32 %v248_v22, %v137_v23 }
 0x183   :  { %v150_v25 = vsub.f32 0.0, %v148_v24 }
 0x184   :  { %v140_v26 = vpop.xlane.xlu0 %139 }
 0x185   :  { %v152_v27 = vmul.f32 1.442695, %v150_v25  ;;  %v149_v28 = vadd.f32 %v248_v22, %v140_v26 }
 0x187   :  { %282 = vpow2.f32 %v152_v27  ;;  %v151_v29 = vsub.f32 0.0, %v149_v28 }
 0x189   :  { %v154_v30 = vmul.f32 1.442695, %v151_v29 }
 0x18b   :  { %284 = vpow2.f32 %v154_v30 }
 0x191   :  { %v283_v31 = vpop.eup %282 }
 0x192   :  { %v156_v32 = vadd.f32 1.0, %v283_v31 }
 0x194   :  { %286 = vrcp.f32 %v156_v32 }
 0x195   :  { %v285_v33 = vpop.eup %284 }
 0x196   :  { %v157_v34 = vadd.f32 1.0, %v285_v33 }
 0x198   :  { %288 = vrcp.f32 %v157_v34 }
 0x19e   :  { %v287_v35 = vpop.eup %286 }
 0x19f   :  { %224 = vst.msk [vmem:[%s422_s7] sm:$0xff] %vm160_vm2, %v287_v35  ;;  %179 = vperm.xlu1 %276, %v287_v35   ;;  %v161_v36 = vsel %vm160_vm2, %v287_v35, 0.0 }
 0x1a0   :  { %v162_v37 = vrot.slane %v161_v36, 4 }
 0x1a2   :  { %v289_v38 = vpop.eup %288  ;;  %v163_v39 = vadd.f32 %v162_v37, %v161_v36 }
 0x1a3   :  { %225 = vst.msk [vmem:[%s422_s7 + $0x8] sm:$0xff] %vm160_vm2, %v289_v38  ;;  %184 = vperm.xlu1 %276, %v289_v38   ;;  %v168_v40 = vsel %vm160_vm2, %v289_v38, 0.0 }
 0x1a4   :  { %v164_v41 = vrot.slane %v163_v39, 2  ;;  %v169_v42 = vrot.slane %v168_v40, 4 }
 0x1a6   :  { %v165_v43 = vadd.f32 %v164_v41, %v163_v39  ;;  %v170_v44 = vadd.f32 %v169_v42, %v168_v40 }
 0x1a8   :  { %v166_v45 = vrot.slane %v165_v43, 1  ;;  %v171_v46 = vrot.slane %v170_v44, 2 }
 0x1aa   :  { %v167_v47 = vadd.f32 %v166_v45, %v165_v43  ;;  %v172_v48 = vadd.f32 %v171_v46, %v170_v44 }
 0x1ac   :  { %290 = vrcp.f32 %v167_v47  ;;  %v173_v49 = vrot.slane %v172_v48, 1 }
 0x1ae   :  { %v174_v50 = vadd.f32 %v173_v49, %v172_v48 }
 0x1b0   :  { %292 = vrcp.f32 %v174_v50 }
 0x1b6   :  { %v291_v51 = vpop.eup %290 }
 0x1b7   :  { %207 = vperm.xlu0 %277, %v291_v51  }
 0x1ba   :  { %v293_v52 = vpop.eup %292 }
 0x1bb   :  { %212 = vperm.xlu1 %276, %v293_v52  }
 0x21e   :  { %v180_v54 = vpop.permute.xlu1 %179 }
 0x21f   :  { %v187_v55 = vmul.f32 %v180_v54, %v175_v53 }
 0x221   :  { %v189_v57 = vsel %vm41_vm0, %v187_v55, 0.0 }
 0x222   :  { %v185_v58 = vpop.permute.xlu1 %184  ;;  %v190_v60 = vrot.slane %v189_v57, 4 }
 0x223   :  { %v188_v59 = vmul.f32 %v185_v58, %v176_v56 }
 0x224   :  { %v191_v63 = vadd.f32 %v190_v60, %v189_v57 }
 0x225   :  { %v196_v61 = vsel %vm41_vm0, %v188_v59, 0.0 }
 0x226   :  { %v197_v62 = vrot.slane %v196_v61, 4  ;;  %v192_v1 = vrot.slane %v191_v63, 2 }
 0x228   :  { %v198_v0 = vadd.f32 %v197_v62, %v196_v61  ;;  %v193_v3 = vadd.f32 %v192_v1, %v191_v63 }
 0x22a   :  { %v199_v2 = vrot.slane %v198_v0, 2  ;;  %v194_v5 = vrot.slane %v193_v3, 1 }
 0x22c   :  { %v200_v4 = vadd.f32 %v199_v2, %v198_v0  ;;  %v195_v8 = vadd.f32 %v194_v5, %v193_v3 }
 0x22e   :  { %v201_v6 = vrot.slane %v200_v4, 1 }
 0x230   :  { %v202_v9 = vadd.f32 %v201_v6, %v200_v4 }
 0x236   :  { %v208_v7 = vpop.permute.xlu0 %207 }
 0x237   :  { %v215_v11 = vmul.f32 %v208_v7, %v195_v8 }
 0x23a   :  { %v213_v10 = vpop.permute.xlu1 %212 }
 0x23b   :  { %v216_v12 = vmul.f32 %v213_v10, %v202_v9 }
 0x23d   :  { %v220_v13 = vsel %vm219_vm3, %v216_v12, %v215_v11 }
 0x23e   :  { %223 = vst.msk [vmem:[#allocation3] sm:$0x3] %vm222_vm4, %v220_v13 }
 0x23f   :  { %305 = shalt.err (!%p302_p4)
}
 0x240   :  { %s306_s25 = scalar_lea.hbm %s421_s6, 32 }
 0x241   :  { %p307_p5 = scmp.ne.s32.totalorder %s421_s6, %s306_s25  ;;  %p310_p6 = scmp.lt.u32.totalorder %s306_s25, %s421_s6 }
 0x243   :  { %p312_p7 = pnand %p310_p6, %p307_p5 }
 0x245   :  { %315 = shalt.err (!%p312_p7)
}
 0x246   :  { %235 = dma.vmem_to_hbm [thread:$0]  %s233_s21, 32, %s421_s6, [#allocation4]  }
 0x247   :  { %316 = dma.done.wait [#allocation4], 32  }
 0x248   :  { %317 = vsyncadd [#allocation4], 4294967264 }
 0x249   :  { %243 = vsyncpa [#allocation4], 1 }

</bundles_post_ra>
